<compile_context>
chip_gen: v7x
topology: tpu7x:2x2x1
jax: 0.10.0
libtpu: 0.0.40
codegen_flags: <defaults>
</compile_context>

<pallas_src>
import functools

import jax
import jax.numpy as jnp
from jax import lax
from jax.experimental import pallas as pl
from jax.experimental.pallas import tpu as pltpu


def _round_up(n, m):
    return ((n + m - 1) // m) * m


def _attention_kernel(x_ref, wq_ref, wk_ref, wv_ref, bq_ref, bk_ref, bv_ref,
                      o_ref, *, batch, seq_len, hidden_dim):
    # Whole problem lives in VMEM; x/weights may be f32 or bf16 (MXU operands),
    # accumulation, bias add and softmax are always f32.
    mxu_dtype = x_ref.dtype
    x = x_ref[...]                                                 # (B*S, Hp)

    q = jnp.dot(x, wq_ref[...], preferred_element_type=jnp.float32) + bq_ref[...]
    k = jnp.dot(x, wk_ref[...], preferred_element_type=jnp.float32) + bk_ref[...]
    v = jnp.dot(x, wv_ref[...], preferred_element_type=jnp.float32) + bv_ref[...]

    scale = 1.0 / float(hidden_dim)       # matches PyTorch module: /hidden_dim
    contract_last = (((1,), (1,)), ((), ()))   # Q @ K^T without a transpose

    # Static per-batch loop (B is a small compile-time constant -> unrolled).
    for b in range(batch):
        lo = b * seq_len
        qb = q[lo:lo + seq_len, :]
        kb = k[lo:lo + seq_len, :]
        vb = v[lo:lo + seq_len, :]

        scores = lax.dot_general(
            qb.astype(mxu_dtype), kb.astype(mxu_dtype),
            dimension_numbers=contract_last,
            preferred_element_type=jnp.float32) * scale

        # Numerically stable softmax along the last axis (f32).
        scores = scores - jnp.max(scores, axis=-1, keepdims=True)
        e = jnp.exp(scores)
        attn = e * pl.reciprocal(jnp.sum(e, axis=-1, keepdims=True), approx=True)

        out = jnp.dot(attn.astype(mxu_dtype), vb.astype(mxu_dtype),
                      preferred_element_type=jnp.float32)
        o_ref[pl.ds(lo, seq_len), :] = out.astype(o_ref.dtype)


def attention_layer(x, wq, wk, wv, bq, bk, bv, *, mxu_dtype=jnp.float32):
    """x: (B, S, H) float32. wq/wk/wv: (H, H) stored so y = x @ W + b matches
    torch.nn.Linear with weight = W.T. bq/bk/bv: (H,)."""
    B, S, H = x.shape
    Hp = _round_up(H, 128)                 # lane-dense last dim (unmasked vst)
    pad = Hp - H
    rows = B * S

    # Flatten batch*seq for the projections; zero-pad the hidden dim (exact).
    x2 = jnp.pad(x.reshape(rows, H), ((0, 0), (0, pad))).astype(mxu_dtype)
    wq2 = jnp.pad(wq, ((0, pad), (0, pad))).astype(mxu_dtype)
    wk2 = jnp.pad(wk, ((0, pad), (0, pad))).astype(mxu_dtype)
    wv2 = jnp.pad(wv, ((0, pad), (0, pad))).astype(mxu_dtype)
    bq2 = jnp.pad(bq, ((0, pad),)).reshape(1, Hp).astype(jnp.float32)
    bk2 = jnp.pad(bk, ((0, pad),)).reshape(1, Hp).astype(jnp.float32)
    bv2 = jnp.pad(bv, ((0, pad),)).reshape(1, Hp).astype(jnp.float32)

    kernel = functools.partial(_attention_kernel, batch=B, seq_len=S,
                               hidden_dim=H)

    def full(shape):
        return pl.BlockSpec(shape, lambda i: (0, 0))

    out = pl.pallas_call(
        kernel,
        out_shape=jax.ShapeDtypeStruct((rows, Hp), jnp.float32),
        grid_spec=pltpu.PrefetchScalarGridSpec(
            num_scalar_prefetch=0,
            grid=(1,),                                 # single invocation
            in_specs=[
                full((rows, Hp)),                      # x (flattened, padded)
                full((Hp, Hp)), full((Hp, Hp)), full((Hp, Hp)),  # Wq, Wk, Wv
                full((1, Hp)), full((1, Hp)), full((1, Hp)),     # bq, bk, bv
            ],
            out_specs=full((rows, Hp)),
        ),
        compiler_params=pltpu.CompilerParams(
            dimension_semantics=("arbitrary",)),
    )(x2, wq2, wk2, wv2, bq2, bk2, bv2)

    return out[:, :H].reshape(B, S, H)


def _reference(x, wq, wk, wv, bq, bk, bv):
    H = x.shape[-1]
    q = x @ wq + bq
    k = x @ wk + bk
    v = x @ wv + bv
    scores = jnp.einsum("bqh,bkh->bqk", q, k) / H
    attn = jax.nn.softmax(scores, axis=-1)
    return jnp.einsum("bqk,bkh->bqh", attn, v)


if __name__ == "__main__":
    B, S, H = 2, 8, 32

    key = jax.random.PRNGKey(0)
    kx, kwq, kwk, kwv, kbq, kbk, kbv = jax.random.split(key, 7)

    x = jax.random.normal(kx, (B, S, H), dtype=jnp.float32)
    # Deterministic synthetic parameters (nn.Linear(hidden_dim, hidden_dim) x3).
    wq = jax.random.normal(kwq, (H, H), dtype=jnp.float32) * 0.1
    wk = jax.random.normal(kwk, (H, H), dtype=jnp.float32) * 0.1
    wv = jax.random.normal(kwv, (H, H), dtype=jnp.float32) * 0.1
    bq = jax.random.normal(kbq, (H,), dtype=jnp.float32) * 0.1
    bk = jax.random.normal(kbk, (H,), dtype=jnp.float32) * 0.1
    bv = jax.random.normal(kbv, (H,), dtype=jnp.float32) * 0.1

    ref = _reference(x, wq, wk, wv, bq, bk, bv)

    # Default f32 MXU path (matches the PyTorch module closely; approx softmax
    # reciprocal is the only approximation).
    out = jax.block_until_ready(attention_layer(x, wq, wk, wv, bq, bk, bv))
    assert out.shape == (B, S, H)
    assert jnp.allclose(out, ref, atol=5e-3, rtol=5e-3), "f32 path mismatch"

    # bf16 MXU-operand path (f32 accumulation) — the per-review fast path on
    # v5e/v6e/v7x; looser tolerance due to bf16 operands.
    out_bf16 = jax.block_until_ready(
        attention_layer(x, wq, wk, wv, bq, bk, bv, mxu_dtype=jnp.bfloat16))
    assert jnp.allclose(out_bf16, ref, atol=3e-2, rtol=3e-2), "bf16 path mismatch"

    print("KERNEL_OK")
</pallas_src>

<mosaic_0001>
module attributes {stable_mosaic.version = 11 : i64} {
  func.func @_attention_kernel(%arg0: i32, %arg1: memref<16x128xf32, #tpu.memory_space<vmem>>, %arg2: memref<128x128xf32, #tpu.memory_space<vmem>>, %arg3: memref<128x128xf32, #tpu.memory_space<vmem>>, %arg4: memref<128x128xf32, #tpu.memory_space<vmem>>, %arg5: memref<1x128xf32, #tpu.memory_space<vmem>>, %arg6: memref<1x128xf32, #tpu.memory_space<vmem>>, %arg7: memref<1x128xf32, #tpu.memory_space<vmem>>, %arg8: memref<16x128xf32, #tpu.memory_space<vmem>>) attributes {dimension_semantics = [#tpu.dimension_semantics<arbitrary>], iteration_bounds = array<i64: 1>, scalar_prefetch = 0 : i64, scratch_operands = 0 : i64, tpu.core_type = #tpu.core_type<tc>, window_params = [{pipeline_mode = #tpu.pipeline_mode<synchronous>, transform_indices = @transform_0, window_bounds = array<i64: 16, 128>}, {pipeline_mode = #tpu.pipeline_mode<synchronous>, transform_indices = @transform_1, window_bounds = array<i64: 128, 128>}, {pipeline_mode = #tpu.pipeline_mode<synchronous>, transform_indices = @transform_2, window_bounds = array<i64: 128, 128>}, {pipeline_mode = #tpu.pipeline_mode<synchronous>, transform_indices = @transform_3, window_bounds = array<i64: 128, 128>}, {pipeline_mode = #tpu.pipeline_mode<synchronous>, transform_indices = @transform_4, window_bounds = array<i64: 1, 128>}, {pipeline_mode = #tpu.pipeline_mode<synchronous>, transform_indices = @transform_5, window_bounds = array<i64: 1, 128>}, {pipeline_mode = #tpu.pipeline_mode<synchronous>, transform_indices = @transform_6, window_bounds = array<i64: 1, 128>}, {pipeline_mode = #tpu.pipeline_mode<synchronous>, transform_indices = @transform_7, window_bounds = array<i64: 16, 128>}]} {
    %c0 = arith.constant 0 : index
    %c0_0 = arith.constant 0 : index
    %0 = vector.load %arg1[%c0, %c0_0] : memref<16x128xf32, #tpu.memory_space<vmem>>, vector<16x128xf32>
    %c0_1 = arith.constant 0 : index
    %c0_2 = arith.constant 0 : index
    %1 = vector.load %arg2[%c0_1, %c0_2] : memref<128x128xf32, #tpu.memory_space<vmem>>, vector<128x128xf32>
    %cst = arith.constant dense<0.000000e+00> : vector<16x128xf32>
    %2 = tpu.matmul %0, %1, %cst {dimension_numbers = #tpu.dot_dimension_numbers<[1], [0], [0], [1], [0, 0, 1, 1], [], []>} : vector<16x128xf32>, vector<128x128xf32>, vector<16x128xf32> -> vector<16x128xf32>
    %c0_3 = arith.constant 0 : index
    %c0_4 = arith.constant 0 : index
    %3 = vector.load %arg5[%c0_3, %c0_4] : memref<1x128xf32, #tpu.memory_space<vmem>>, vector<1x128xf32>
    %4 = vector.broadcast %3 : vector<1x128xf32> to vector<16x128xf32>
    %5 = arith.addf %2, %4 : vector<16x128xf32>
    %c0_5 = arith.constant 0 : index
    %c0_6 = arith.constant 0 : index
    %6 = vector.load %arg3[%c0_5, %c0_6] : memref<128x128xf32, #tpu.memory_space<vmem>>, vector<128x128xf32>
    %cst_7 = arith.constant dense<0.000000e+00> : vector<16x128xf32>
    %7 = tpu.matmul %0, %6, %cst_7 {dimension_numbers = #tpu.dot_dimension_numbers<[1], [0], [0], [1], [0, 0, 1, 1], [], []>} : vector<16x128xf32>, vector<128x128xf32>, vector<16x128xf32> -> vector<16x128xf32>
    %c0_8 = arith.constant 0 : index
    %c0_9 = arith.constant 0 : index
    %8 = vector.load %arg6[%c0_8, %c0_9] : memref<1x128xf32, #tpu.memory_space<vmem>>, vector<1x128xf32>
    %9 = vector.broadcast %8 : vector<1x128xf32> to vector<16x128xf32>
    %10 = arith.addf %7, %9 : vector<16x128xf32>
    %c0_10 = arith.constant 0 : index
    %c0_11 = arith.constant 0 : index
    %11 = vector.load %arg4[%c0_10, %c0_11] : memref<128x128xf32, #tpu.memory_space<vmem>>, vector<128x128xf32>
    %cst_12 = arith.constant dense<0.000000e+00> : vector<16x128xf32>
    %12 = tpu.matmul %0, %11, %cst_12 {dimension_numbers = #tpu.dot_dimension_numbers<[1], [0], [0], [1], [0, 0, 1, 1], [], []>} : vector<16x128xf32>, vector<128x128xf32>, vector<16x128xf32> -> vector<16x128xf32>
    %c0_13 = arith.constant 0 : index
    %c0_14 = arith.constant 0 : index
    %13 = vector.load %arg7[%c0_13, %c0_14] : memref<1x128xf32, #tpu.memory_space<vmem>>, vector<1x128xf32>
    %14 = vector.broadcast %13 : vector<1x128xf32> to vector<16x128xf32>
    %15 = arith.addf %12, %14 : vector<16x128xf32>
    %16 = vector.extract_strided_slice %5 {offsets = [0, 0], sizes = [8, 128], strides = [1, 1]} : vector<16x128xf32> to vector<8x128xf32>
    %17 = vector.extract_strided_slice %10 {offsets = [0, 0], sizes = [8, 128], strides = [1, 1]} : vector<16x128xf32> to vector<8x128xf32>
    %18 = vector.extract_strided_slice %15 {offsets = [0, 0], sizes = [8, 128], strides = [1, 1]} : vector<16x128xf32> to vector<8x128xf32>
    %cst_15 = arith.constant dense<0.000000e+00> : vector<8x8xf32>
    %19 = tpu.matmul %16, %17, %cst_15 {dimension_numbers = #tpu.dot_dimension_numbers<[1], [1], [0], [0], [0, 0, 1, 0], [], []>} : vector<8x128xf32>, vector<8x128xf32>, vector<8x8xf32> -> vector<8x8xf32>
    %cst_16 = arith.constant 3.125000e-02 : f32
    %20 = vector.broadcast %cst_16 : f32 to vector<8x8xf32>
    %21 = arith.mulf %19, %20 : vector<8x8xf32>
    %cst_17 = arith.constant dense<0xFF800000> : vector<8xf32>
    %22 = vector.multi_reduction <maximumf>, %21, %cst_17 [1] : vector<8x8xf32> to vector<8xf32>
    %23 = vector.shape_cast %22 : vector<8xf32> to vector<8x1xf32>
    %24 = vector.broadcast %23 : vector<8x1xf32> to vector<8x8xf32>
    %25 = arith.subf %21, %24 : vector<8x8xf32>
    %26 = math.exp %25 : vector<8x8xf32>
    %cst_18 = arith.constant dense<0.000000e+00> : vector<8xf32>
    %27 = vector.multi_reduction <add>, %26, %cst_18 [1] : vector<8x8xf32> to vector<8xf32>
    %28 = vector.shape_cast %27 : vector<8xf32> to vector<8x1xf32>
    %29 = tpu.reciprocal %28 {approx = true} : vector<8x1xf32> -> vector<8x1xf32>
    %30 = vector.broadcast %29 : vector<8x1xf32> to vector<8x8xf32>
    %31 = arith.mulf %26, %30 : vector<8x8xf32>
    %cst_19 = arith.constant dense<0.000000e+00> : vector<8x128xf32>
    %32 = tpu.matmul %31, %18, %cst_19 {dimension_numbers = #tpu.dot_dimension_numbers<[1], [0], [0], [1], [0, 0, 1, 1], [], []>} : vector<8x8xf32>, vector<8x128xf32>, vector<8x128xf32> -> vector<8x128xf32>
    %c0_20 = arith.constant 0 : index
    %c0_21 = arith.constant 0 : index
    %33 = vector.load %arg8[%c0_20, %c0_21] : memref<16x128xf32, #tpu.memory_space<vmem>>, vector<8x128xf32>
    tpu.vector_store %arg8[%c0_20, %c0_21], %32 {strides = array<i32>} : memref<16x128xf32, #tpu.memory_space<vmem>>, vector<8x128xf32>,
    %34 = vector.extract_strided_slice %5 {offsets = [8, 0], sizes = [8, 128], strides = [1, 1]} : vector<16x128xf32> to vector<8x128xf32>
    %35 = vector.extract_strided_slice %10 {offsets = [8, 0], sizes = [8, 128], strides = [1, 1]} : vector<16x128xf32> to vector<8x128xf32>
    %36 = vector.extract_strided_slice %15 {offsets = [8, 0], sizes = [8, 128], strides = [1, 1]} : vector<16x128xf32> to vector<8x128xf32>
    %cst_22 = arith.constant dense<0.000000e+00> : vector<8x8xf32>
    %37 = tpu.matmul %34, %35, %cst_22 {dimension_numbers = #tpu.dot_dimension_numbers<[1], [1], [0], [0], [0, 0, 1, 0], [], []>} : vector<8x128xf32>, vector<8x128xf32>, vector<8x8xf32> -> vector<8x8xf32>
    %cst_23 = arith.constant 3.125000e-02 : f32
    %38 = vector.broadcast %cst_23 : f32 to vector<8x8xf32>
    %39 = arith.mulf %37, %38 : vector<8x8xf32>
    %cst_24 = arith.constant dense<0xFF800000> : vector<8xf32>
    %40 = vector.multi_reduction <maximumf>, %39, %cst_24 [1] : vector<8x8xf32> to vector<8xf32>
    %41 = vector.shape_cast %40 : vector<8xf32> to vector<8x1xf32>
    %42 = vector.broadcast %41 : vector<8x1xf32> to vector<8x8xf32>
    %43 = arith.subf %39, %42 : vector<8x8xf32>
    %44 = math.exp %43 : vector<8x8xf32>
    %cst_25 = arith.constant dense<0.000000e+00> : vector<8xf32>
    %45 = vector.multi_reduction <add>, %44, %cst_25 [1] : vector<8x8xf32> to vector<8xf32>
    %46 = vector.shape_cast %45 : vector<8xf32> to vector<8x1xf32>
    %47 = tpu.reciprocal %46 {approx = true} : vector<8x1xf32> -> vector<8x1xf32>
    %48 = vector.broadcast %47 : vector<8x1xf32> to vector<8x8xf32>
    %49 = arith.mulf %44, %48 : vector<8x8xf32>
    %cst_26 = arith.constant dense<0.000000e+00> : vector<8x128xf32>
    %50 = tpu.matmul %49, %36, %cst_26 {dimension_numbers = #tpu.dot_dimension_numbers<[1], [0], [0], [1], [0, 0, 1, 1], [], []>} : vector<8x8xf32>, vector<8x128xf32>, vector<8x128xf32> -> vector<8x128xf32>
    %c8 = arith.constant 8 : index
    %c0_27 = arith.constant 0 : index
    %51 = vector.load %arg8[%c8, %c0_27] : memref<16x128xf32, #tpu.memory_space<vmem>>, vector<8x128xf32>
    tpu.vector_store %arg8[%c8, %c0_27], %50 {strides = array<i32>} : memref<16x128xf32, #tpu.memory_space<vmem>>, vector<8x128xf32>,
    return
  }
  func.func @transform_0(%arg0: i32) -> (i32, i32) {
    %c0_i32 = arith.constant 0 : i32
    %c0_i32_0 = arith.constant 0 : i32
    %c0_i32_1 = arith.constant 0 : i32
    return %c0_i32, %c0_i32_0 : i32, i32
  }
  func.func @transform_1(%arg0: i32) -> (i32, i32) {
    %c0_i32 = arith.constant 0 : i32
    %c0_i32_0 = arith.constant 0 : i32
    %c0_i32_1 = arith.constant 0 : i32
    return %c0_i32, %c0_i32_0 : i32, i32
  }
  func.func @transform_2(%arg0: i32) -> (i32, i32) {
    %c0_i32 = arith.constant 0 : i32
    %c0_i32_0 = arith.constant 0 : i32
    %c0_i32_1 = arith.constant 0 : i32
    return %c0_i32, %c0_i32_0 : i32, i32
  }
  func.func @transform_3(%arg0: i32) -> (i32, i32) {
    %c0_i32 = arith.constant 0 : i32
    %c0_i32_0 = arith.constant 0 : i32
    %c0_i32_1 = arith.constant 0 : i32
    return %c0_i32, %c0_i32_0 : i32, i32
  }
  func.func @transform_4(%arg0: i32) -> (i32, i32) {
    %c0_i32 = arith.constant 0 : i32
    %c0_i32_0 = arith.constant 0 : i32
    %c0_i32_1 = arith.constant 0 : i32
    return %c0_i32, %c0_i32_0 : i32, i32
  }
  func.func @transform_5(%arg0: i32) -> (i32, i32) {
    %c0_i32 = arith.constant 0 : i32
    %c0_i32_0 = arith.constant 0 : i32
    %c0_i32_1 = arith.constant 0 : i32
    return %c0_i32, %c0_i32_0 : i32, i32
  }
  func.func @transform_6(%arg0: i32) -> (i32, i32) {
    %c0_i32 = arith.constant 0 : i32
    %c0_i32_0 = arith.constant 0 : i32
    %c0_i32_1 = arith.constant 0 : i32
    return %c0_i32, %c0_i32_0 : i32, i32
  }
  func.func @transform_7(%arg0: i32) -> (i32, i32) {
    %c0_i32 = arith.constant 0 : i32
    %c0_i32_0 = arith.constant 0 : i32
    %c0_i32_1 = arith.constant 0 : i32
    return %c0_i32, %c0_i32_0 : i32, i32
  }
}

</mosaic_0001>

<bundles_post_ra>
// kernel: tpu_custom_call.1
= control target key start
LH: loop header
LB: loop body
LE: loop exit
PB: predicated region body
PF: predicated region fallthrough
CT: control target
= control target key end

     0   :  { %12 = vsyncpa [#allocation3], 0  ;;  %s1304_s0 = inlined_call_operand.hbm [shape: f32[16,128], index: 0, kind: input, shape index: {}]   ;;  %s1305_s1 = inlined_call_operand.hbm [shape: f32[128,128], index: 1, kind: input, shape index: {}]   ;;  %s1306_s2 = inlined_call_operand.hbm [shape: f32[128,128], index: 2, kind: input, shape index: {}]   ;;  %s1307_s3 = inlined_call_operand.hbm [shape: f32[128,128], index: 3, kind: input, shape index: {}]   ;;  %s1308_s4 = inlined_call_operand.vmem [shape: f32[1,128], index: 4, kind: input, shape index: {}]   ;;  %s1309_s5 = inlined_call_operand.vmem [shape: f32[1,128], index: 5, kind: input, shape index: {}]   ;;  %s1310_s6 = inlined_call_operand.vmem [shape: f32[1,128], index: 6, kind: input, shape index: {}]   ;;  %s1311_s7 = inlined_call_operand.hbm [shape: f32[16,128], index: 7, kind: output, shape index: {}]  }
   0x1   :  { %13 = vsyncpa [#allocation6], 0 }
   0x2   :  { %14 = vsyncpa [#allocation9], 0 }
   0x3   :  { %15 = vsyncpa [#allocation4], 0  ;;  %s1133_s24 = smov [#allocation5]   ;;  %s1134_s26 = smov [#allocation2]  }
   0x4   :  { %s33_s25 = sshll.u32 %s1133_s24, 4  ;;  %s21_s27 = sshll.u32 %s1134_s26, 4  ;;  %s34_s25 = int_to_ptr.vmem [resolvable:$true] %s33_s25  ;;  %s1182_s27 = int_to_ptr.vmem [resolvable:$true] %s21_s27 }
   0x5   :  { %s1015_s30 = scalar_lea.hbm %s1305_s1, 2048 }
   0x6   :  { %p1016_p0 = scmp.ne.s32.totalorder %s1305_s1, %s1015_s30  ;;  %p1019_p1 = scmp.lt.u32.totalorder %s1015_s30, %s1305_s1 }
   0x8   :  { %p1021_p2 = pnand %p1019_p1, %p1016_p0 }
   0xa   :  { %1024 = shalt.err (!%p1021_p2)
}
   0xb   :  { %s1025_s12 = scalar_lea.vmem %s34_s25, 2048  ;;  %p1030_p4 = scmp.lt.s32.totalorder %s34_s25, %s34_s25 }
   0xc   :  { %p1026_p3 = scmp.ne.s32.totalorder %s34_s25, %s1025_s12  ;;  %p1031_p5 = scmp.lt.s32.totalorder %s1025_s12, %s1025_s12 }
   0xe   :  { %p1032_p6 = por %p1031_p5, %p1030_p4 }
  0x10   :  { %p1033_p7 = pnand %p1032_p6, %p1026_p3 }
  0x12   :  { %1036 = shalt.err (!%p1033_p7)
}
  0x13   :  { %s1135_s13 = smov 128   ;;  %s1136_s14 = smov 8  }
  0x14   :  { %39 = dma.hbm_to_vmem [thread:$0]  %s1305_s1, 2048, %s34_s25, [#allocation6], %s1135_s13, %s1135_s13, %s1136_s14  }
  0x15   :  { %s1037_s19 = scalar_lea.hbm %s1304_s0, 256 }
  0x16   :  { %p1038_p8 = scmp.ne.s32.totalorder %s1304_s0, %s1037_s19  ;;  %p1041_p9 = scmp.lt.u32.totalorder %s1037_s19, %s1304_s0 }
  0x18   :  { %p1043_p10 = pnand %p1041_p9, %p1038_p8 }
  0x1a   :  { %1046 = shalt.err (!%p1043_p10)
}
  0x1b   :  { %s1047_s24 = scalar_lea.vmem %s1182_s27, 256  ;;  %p1052_p12 = scmp.lt.s32.totalorder %s1182_s27, %s1182_s27 }
  0x1c   :  { %p1048_p11 = scmp.ne.s32.totalorder %s1182_s27, %s1047_s24  ;;  %p1053_p13 = scmp.lt.s32.totalorder %s1047_s24, %s1047_s24 }
  0x1e   :  { %p1054_p0 = por %p1053_p13, %p1052_p12 }
  0x20   :  { %p1055_p1 = pnand %p1054_p0, %p1048_p11 }
  0x22   :  { %1058 = shalt.err (!%p1055_p1)
}
  0x23   :  { %27 = dma.hbm_to_vmem [thread:$0]  %s1304_s0, 256, %s1182_s27, [#allocation3], %s1135_s13, %s1135_s13, %s1136_s14  }
  0x24   :  { %s1137_s26 = smov [#allocation7]   ;;  %s1138_s29 = smov [#allocation8]  }
  0x25   :  { %s45_s28 = sshll.u32 %s1137_s26, 4  ;;  %s57_s30 = sshll.u32 %s1138_s29, 4  ;;  %s46_s28 = int_to_ptr.vmem [resolvable:$true] %s45_s28  ;;  %s1219_s30 = int_to_ptr.vmem [resolvable:$true] %s57_s30 }
  0x26   :  { %s1059_s10 = scalar_lea.hbm %s1306_s2, 2048 }
  0x27   :  { %p1060_p2 = scmp.ne.s32.totalorder %s1306_s2, %s1059_s10  ;;  %p1063_p3 = scmp.lt.u32.totalorder %s1059_s10, %s1306_s2 }
  0x29   :  { %p1065_p4 = pnand %p1063_p3, %p1060_p2 }
  0x2b   :  { %1068 = shalt.err (!%p1065_p4)
}
  0x2c   :  { %s1069_s0 = scalar_lea.vmem %s46_s28, 2048  ;;  %p1074_p6 = scmp.lt.s32.totalorder %s46_s28, %s46_s28 }
  0x2d   :  { %p1070_p5 = scmp.ne.s32.totalorder %s46_s28, %s1069_s0  ;;  %p1075_p7 = scmp.lt.s32.totalorder %s1069_s0, %s1069_s0 }
  0x2f   :  { %p1076_p8 = por %p1075_p7, %p1074_p6 }
  0x31   :  { %p1077_p9 = pnand %p1076_p8, %p1070_p5 }
  0x33   :  { %1080 = shalt.err (!%p1077_p9)
}
  0x34   :  { %51 = dma.hbm_to_vmem [thread:$0]  %s1306_s2, 2048, %s46_s28, [#allocation6], %s1135_s13, %s1135_s13, %s1136_s14  }
  0x35   :  { %s1081_s20 = scalar_lea.hbm %s1307_s3, 2048 }
  0x36   :  { %p1082_p10 = scmp.ne.s32.totalorder %s1307_s3, %s1081_s20  ;;  %p1085_p11 = scmp.lt.u32.totalorder %s1081_s20, %s1307_s3 }
  0x38   :  { %p1087_p12 = pnand %p1085_p11, %p1082_p10 }
  0x3a   :  { %1090 = shalt.err (!%p1087_p12)
}
  0x3b   :  { %s1091_s1 = scalar_lea.vmem %s1219_s30, 2048  ;;  %p1096_p0 = scmp.lt.s32.totalorder %s1219_s30, %s1219_s30 }
  0x3c   :  { %p1092_p13 = scmp.ne.s32.totalorder %s1219_s30, %s1091_s1  ;;  %p1097_p1 = scmp.lt.s32.totalorder %s1091_s1, %s1091_s1 }
  0x3e   :  { %p1098_p2 = por %p1097_p1, %p1096_p0 }
  0x40   :  { %p1099_p3 = pnand %p1098_p2, %p1092_p13 }
  0x42   :  { %1102 = shalt.err (!%p1099_p3)
}
  0x43   :  { %63 = dma.hbm_to_vmem [thread:$0]  %s1307_s3, 2048, %s1219_s30, [#allocation9], %s1135_s13, %s1135_s13, %s1136_s14  }
  0x44   :  { %1125 = dma.done.wait [#allocation3], 256  }
  0x45   :  { %1126 = vsyncadd [#allocation3], 4294967040 }
  0x46   :  { %1127 = dma.done.wait [#allocation6], 4096  }
  0x47   :  { %1128 = vsyncadd [#allocation6], 4294963200 }
  0x48   :  { %1129 = dma.done.wait [#allocation9], 2048  }
  0x49   :  { %1130 = vsyncadd [#allocation9], 4294965248  ;;  %v182_v0 = vld [vmem:[#allocation7] sm:$0xff]  ;;  %v183_v1 = vld [vmem:[#allocation7 + $0x8] sm:$0xff]  ;;  %v1139_v50 = vmov 0.0   ;;  %vm1140_vm0 = vmmov 0  }
  0x4a   :  { %v84_v2 = vld [vmem:[#allocation5] sm:$0xff]  ;;  %v934_v3 = vpack.c.bf16 %v183_v1, %v182_v0  ;;  %v85_v4 = vld [vmem:[#allocation5 + $0x8] sm:$0xff]  ;;  %v184_v5 = vld [vmem:[#allocation7 + $0x10] sm:$0xff]  ;;  %vm449_vm1 = vcmask 64512  }
  0x4b   :  { %v185_v6 = vld [vmem:[#allocation7 + $0x18] sm:$0xff]  ;;  %v902_v7 = vpack.c.bf16 %v85_v4, %v84_v2  ;;  %v86_v9 = vld [vmem:[#allocation5 + $0x10] sm:$0xff]  ;;  %v186_v11 = vld [vmem:[#allocation7 + $0x20] sm:$0xff] }
  0x4c   :  { %v938_v8 = vpack.c.bf16 %v185_v6, %v184_v5  ;;  %v87_v10 = vld [vmem:[#allocation5 + $0x18] sm:$0xff]  ;;  %935 = vmatprep.subr.bf16.mxu1 %v934_v3  ;;  %v187_v13 = vld [vmem:[#allocation7 + $0x28] sm:$0xff]  ;;  %v88_v14 = vld [vmem:[#allocation5 + $0x20] sm:$0xff] }
  0x4d   :  { %v906_v12 = vpack.c.bf16 %v87_v10, %v86_v9  ;;  %v89_v15 = vld [vmem:[#allocation5 + $0x28] sm:$0xff]  ;;  %937 = vmatpush3.bf16.msra.mxu1 %v934_v3  ;;  %903 = vmatprep.subr.bf16.mxu0 %v902_v7  ;;  %v942_v16 = vpack.c.bf16 %v187_v13, %v186_v11  ;;  %v188_v18 = vld [vmem:[#allocation7 + $0x30] sm:$0xff]  ;;  %v189_v19 = vld [vmem:[#allocation7 + $0x38] sm:$0xff] }
  0x4e   :  { %905 = vmatpush3.bf16.msra.mxu0 %v902_v7  ;;  %939 = vmatprep.subr.bf16.mxu1 %v938_v8  ;;  %v910_v17 = vpack.c.bf16 %v89_v15, %v88_v14  ;;  %v90_v20 = vld [vmem:[#allocation5 + $0x30] sm:$0xff]  ;;  %v91_v21 = vld [vmem:[#allocation5 + $0x38] sm:$0xff]  ;;  %v946_v22 = vpack.c.bf16 %v189_v19, %v188_v18  ;;  %v190_v24 = vld [vmem:[#allocation7 + $0x40] sm:$0xff] }
  0x4f   :  { %907 = vmatprep.subr.bf16.mxu0 %v906_v12  ;;  %v914_v23 = vpack.c.bf16 %v91_v21, %v90_v20  ;;  %v191_v25 = vld [vmem:[#allocation7 + $0x48] sm:$0xff]  ;;  %v82_v26 = vld [vmem:[#allocation2] sm:$0xff]  ;;  %v92_v27 = vld [vmem:[#allocation5 + $0x40] sm:$0xff] }
  0x50   :  { %v93_v28 = vld [vmem:[#allocation5 + $0x48] sm:$0xff]  ;;  %844 = vmatprep.mubr.f32.mxu1 %v82_v26  ;;  %809 = vmatprep.mubr.f32.mxu0 %v82_v26  ;;  %v950_v29 = vpack.c.bf16 %v191_v25, %v190_v24  ;;  %v192_v31 = vld [vmem:[#allocation7 + $0x50] sm:$0xff]  ;;  %v193_v32 = vld [vmem:[#allocation7 + $0x58] sm:$0xff] }
  0x51   :  { %941 = vmatpush3.bf16.msra.mxu1 %v938_v8  ;;  %v918_v30 = vpack.c.bf16 %v93_v28, %v92_v27  ;;  %v94_v33 = vld [vmem:[#allocation5 + $0x50] sm:$0xff]  ;;  %v95_v34 = vld [vmem:[#allocation5 + $0x58] sm:$0xff]  ;;  %v954_v35 = vpack.c.bf16 %v193_v32, %v192_v31  ;;  %v194_v37 = vld [vmem:[#allocation7 + $0x60] sm:$0xff] }
  0x52   :  { %909 = vmatpush3.bf16.msra.mxu0 %v906_v12  ;;  %943 = vmatprep.subr.bf16.mxu1 %v942_v16  ;;  %v922_v36 = vpack.c.bf16 %v95_v34, %v94_v33  ;;  %v195_v38 = vld [vmem:[#allocation7 + $0x68] sm:$0xff]  ;;  %v96_v39 = vld [vmem:[#allocation5 + $0x60] sm:$0xff]  ;;  %v196_v43 = vld [vmem:[#allocation7 + $0x70] sm:$0xff] }
  0x53   :  { %911 = vmatprep.subr.bf16.mxu0 %v910_v17  ;;  %v97_v40 = vld [vmem:[#allocation5 + $0x68] sm:$0xff]  ;;  %v958_v41 = vpack.c.bf16 %v195_v38, %v194_v37  ;;  %v197_v44 = vld [vmem:[#allocation7 + $0x78] sm:$0xff]  ;;  %v98_v45 = vld [vmem:[#allocation5 + $0x70] sm:$0xff] }
  0x54   :  { %v926_v42 = vpack.c.bf16 %v97_v40, %v96_v39  ;;  %v99_v46 = vld [vmem:[#allocation5 + $0x78] sm:$0xff]  ;;  %v962_v47 = vpack.c.bf16 %v197_v44, %v196_v43  ;;  %v711_v51 = vld [vmem:[%s1309_s5] ss:$0 sm:$0xff]  ;;  %v280_v61 = vld [vmem:[#allocation8] sm:$0xff] }
  0x55   :  { %945 = vmatpush3.bf16.msra.mxu1 %v942_v16  ;;  %v930_v48 = vpack.c.bf16 %v99_v46, %v98_v45  ;;  %v83_v49 = vld [vmem:[#allocation2 + $0x8] sm:$0xff]  ;;  %v710_v52 = vld [vmem:[%s1308_s4] ss:$0 sm:$0xff]  ;;  %v281_v62 = vld [vmem:[#allocation8 + $0x8] sm:$0xff] }
  0x56   :  { %913 = vmatpush3.bf16.msra.mxu0 %v910_v17  ;;  %947 = vmatprep.subr.bf16.mxu1 %v946_v22  ;;  %v282_v63 = vld [vmem:[#allocation8 + $0x10] sm:$0xff]  ;;  %v966_v0 = vpack.c.bf16 %v281_v62, %v280_v61  ;;  %v283_v1 = vld [vmem:[#allocation8 + $0x18] sm:$0xff]  ;;  %v284_v3 = vld [vmem:[#allocation8 + $0x20] sm:$0xff] }
  0x57   :  { %915 = vmatprep.subr.bf16.mxu0 %v914_v23  ;;  %v970_v2 = vpack.c.bf16 %v283_v1, %v282_v63  ;;  %v285_v4 = vld [vmem:[#allocation8 + $0x28] sm:$0xff]  ;;  %v286_v6 = vld [vmem:[#allocation8 + $0x30] sm:$0xff]  ;;  %v287_v7 = vld [vmem:[#allocation8 + $0x38] sm:$0xff] }
  0x58   :  { %v974_v5 = vpack.c.bf16 %v285_v4, %v284_v3  ;;  %v978_v8 = vpack.c.bf16 %v287_v7, %v286_v6  ;;  %v288_v9 = vld [vmem:[#allocation8 + $0x40] sm:$0xff]  ;;  %v289_v10 = vld [vmem:[#allocation8 + $0x48] sm:$0xff]  ;;  %v290_v12 = vld [vmem:[#allocation8 + $0x50] sm:$0xff] }
  0x59   :  { %949 = vmatpush3.bf16.msra.mxu1 %v946_v22  ;;  %v982_v11 = vpack.c.bf16 %v289_v10, %v288_v9  ;;  %v291_v13 = vld [vmem:[#allocation8 + $0x58] sm:$0xff]  ;;  %v292_v15 = vld [vmem:[#allocation8 + $0x60] sm:$0xff]  ;;  %v293_v16 = vld [vmem:[#allocation8 + $0x68] sm:$0xff] }
  0x5a   :  { %917 = vmatpush3.bf16.msra.mxu0 %v914_v23  ;;  %951 = vmatprep.subr.bf16.mxu1 %v950_v29  ;;  %v986_v14 = vpack.c.bf16 %v291_v13, %v290_v12  ;;  %v990_v17 = vpack.c.bf16 %v293_v16, %v292_v15  ;;  %v294_v18 = vld [vmem:[#allocation8 + $0x70] sm:$0xff]  ;;  %v295_v19 = vld [vmem:[#allocation8 + $0x78] sm:$0xff] }
  0x5b   :  { %919 = vmatprep.subr.bf16.mxu0 %v918_v30  ;;  %v994_v20 = vpack.c.bf16 %v295_v19, %v294_v18  ;;  %v712_v31 = vld [vmem:[%s1310_s6] ss:$0 sm:$0xff]  ;;  %s1141_s6 = smov [#allocation10]  }
  0x5c   :  { %s696_s30 = sshll.u32 %s1141_s6, 4  ;;  %s697_s30 = int_to_ptr.vmem [resolvable:$true] %s696_s30 }
  0x5d   :  { %953 = vmatpush3.bf16.msra.mxu1 %v950_v29  ;;  %s1103_s8 = scalar_lea.vmem %s697_s30, 256  ;;  %p1108_p5 = scmp.lt.s32.totalorder %s697_s30, %s697_s30 }
  0x5e   :  { %921 = vmatpush3.bf16.msra.mxu0 %v918_v30  ;;  %955 = vmatprep.subr.bf16.mxu1 %v954_v35  ;;  %p1104_p4 = scmp.ne.s32.totalorder %s697_s30, %s1103_s8  ;;  %p1109_p6 = scmp.lt.s32.totalorder %s1103_s8, %s1103_s8 }
  0x5f   :  { %923 = vmatprep.subr.bf16.mxu0 %v922_v36 }
  0x60   :  { %p1110_p7 = por %p1109_p6, %p1108_p5 }
  0x61   :  { %957 = vmatpush3.bf16.msra.mxu1 %v954_v35 }
  0x62   :  { %925 = vmatpush3.bf16.msra.mxu0 %v922_v36  ;;  %959 = vmatprep.subr.bf16.mxu1 %v958_v41  ;;  %p1111_p8 = pnand %p1110_p7, %p1104_p4 }
  0x63   :  { %927 = vmatprep.subr.bf16.mxu0 %v926_v42 }
  0x65   :  { %961 = vmatpush3.bf16.msra.mxu1 %v958_v41 }
  0x66   :  { %929 = vmatpush3.bf16.msra.mxu0 %v926_v42  ;;  %963 = vmatprep.subr.bf16.mxu1 %v962_v47 }
  0x67   :  { %931 = vmatprep.subr.bf16.mxu0 %v930_v48 }
  0x69   :  { %965 = vmatpush3.bf16.msra.mxu1 %v962_v47 }
  0x6a   :  { %933 = vmatpush3.bf16.msra.mxu0 %v930_v48  ;;  %882 = vmatprep.subr.mxu1 %v1139_v50 }
  0x6b   :  { %967 = vmatprep.subr.bf16.mxu0 %v966_v0 }
  0x6c   :  { %845 = vmatmul.mubr.f32.vlgmr.msra.gmra.mrb[0].mxu1 %v83_v49 }
  0x6d   :  { %810 = vmatmul.mubr.f32.vlgmr.msra.gmra.mrb[0].mxu0 %v83_v49  ;;  %884 = vmatprep.mubr.msk.f32.mxu1 %vm1140_vm0, %v1139_v50 }
  0x6e   :  { %879 = vmatprep.mubr.f32.mxu0 %v82_v26  ;;  %969 = vmatpush3.bf16.msra.mxu0 %v966_v0 }
  0x6f   :  { %971 = vmatprep.subr.bf16.mxu0 %v970_v2 }
  0x72   :  { %973 = vmatpush3.bf16.msra.mxu0 %v970_v2 }
  0x73   :  { %975 = vmatprep.subr.bf16.mxu0 %v974_v5 }
  0x76   :  { %977 = vmatpush3.bf16.msra.mxu0 %v974_v5 }
  0x77   :  { %979 = vmatprep.subr.bf16.mxu0 %v978_v8 }
  0x7a   :  { %981 = vmatpush3.bf16.msra.mxu0 %v978_v8 }
  0x7b   :  { %983 = vmatprep.subr.bf16.mxu0 %v982_v11 }
  0x7e   :  { %985 = vmatpush3.bf16.msra.mxu0 %v982_v11 }
  0x7f   :  { %987 = vmatprep.subr.bf16.mxu0 %v986_v14 }
  0x82   :  { %989 = vmatpush3.bf16.msra.mxu0 %v986_v14 }
  0x83   :  { %991 = vmatprep.subr.bf16.mxu0 %v990_v17 }
  0x86   :  { %993 = vmatpush3.bf16.msra.mxu0 %v990_v17 }
  0x87   :  { %995 = vmatprep.subr.bf16.mxu0 %v994_v20 }
  0x8a   :  { %997 = vmatpush3.bf16.msra.mxu0 %v994_v20 }
  0x8d   :  { %880 = vmatmul.mubr.f32.vlgmr.msra.gmra.mrb[2].mxu0 %v83_v49 }
 0x13f   :  { %v846_v53 = vpop.f32.mrb[0].mxu1 }
 0x140   :  { %v1265_v54 = vadd.f32 %v846_v53, %v711_v51  ;;  %v271_v55 = vpop.f32.mrb[1].mxu1  ;;  %v811_v56 = vpop.f32.mrb[0].mxu0 }
 0x141   :  { %v272_v57 = vadd.f32 %v711_v51, %v271_v55  ;;  %v1267_v58 = vadd.f32 %v811_v56, %v710_v52  ;;  %v173_v59 = vpop.f32.mrb[1].mxu0 }
 0x142   :  { %v174_v60 = vadd.f32 %v710_v52, %v173_v59 }
 0x143   :  { %883 = vmatpush3.xpose.msra.mxu1 %v272_v57 }
 0x144   :  { %887 = vmatprep.subr.mxu1 %v1139_v50 }
 0x146   :  { %885 = vmatmul.mubr.f32.vlgmr.msra.gmra.mrb[2].mxu1 %v174_v60 }
 0x147   :  { %889 = vmatprep.mubr.msk.f32.mxu1 %vm1140_vm0, %v1139_v50 }
 0x160   :  { %v881_v30 = vpop.f32.mrb[2].mxu0 }
 0x161   :  { %v369_v32 = vpop.f32.mrb[3].mxu0  ;;  %v375_v33 = vadd.f32 %v881_v30, %v712_v31 }
 0x162   :  { %v370_v34 = vadd.f32 %v712_v31, %v369_v32 }
 0x164   :  { %888 = vmatpush3.msra.mxu1 %v370_v34 }
 0x165   :  { %892 = vmatprep.subr.mxu1 %v1139_v50 }
 0x219   :  { %v444_v21 = vpop.f32.mrb[2].mxu1 }
 0x21a   :  { %v448_v22 = vmul.f32 0.03125, %v444_v21  ;;  %v886_v23 = vpop.f32.mrb[3].mxu1 }
 0x21c   :  { %v450_v24 = vsel %vm449_vm1, %v448_v22, -inf }
 0x21d   :  { %451 = vmax.xlane.f32.xlu0 %v450_v24 }
 0x2aa   :  { %v452_v25 = vpop.xlane.xlu0 %451 }
 0x2ab   :  { %v453_v26 = vsub.f32 %v448_v22, %v452_v25 }
 0x2ad   :  { %v454_v27 = vmul.f32 1.442695, %v453_v26 }
 0x2af   :  { %1007 = vpow2.f32 %v454_v27 }
 0x2b9   :  { %v1008_v28 = vpop.eup %1007 }
 0x2ba   :  { %v456_v29 = vsel %vm449_vm1, %v1008_v28, 0.0 }
 0x2bb   :  { %457 = vadd.xlane.f32.xlu0 %v456_v29 }
 0x348   :  { %v458_v35 = vpop.xlane.xlu0 %457 }
 0x349   :  { %1009 = vrcp.f32 %v458_v35 }
 0x353   :  { %v1010_v36 = vpop.eup %1009 }
 0x354   :  { %v460_v37 = vmul.f32 %v1010_v36, %v1008_v28 }
 0x356   :  { %890 = vmatmul.mubr.msk.f32.vlgmr.msra.gmra.mrb[4].mxu1 %vm449_vm1, %v460_v37 }
 0x357   :  { %893 = vmatpush3.xpose.msra.mxu1 %v1265_v54  ;;  %894 = vmatprep.mubr.msk.f32.mxu1 %vm1140_vm0, %v1139_v50 }
 0x358   :  { %897 = vmatprep.subr.mxu1 %v1139_v50 }
 0x35a   :  { %895 = vmatmul.mubr.f32.vlgmr.msra.gmra.mrb[6].mxu1 %v1267_v58 }
 0x35b   :  { %898 = vmatpush3.msra.mxu1 %v375_v33  ;;  %899 = vmatprep.mubr.msk.f32.mxu1 %vm1140_vm0, %v1139_v50 }
 0x429   :  { %v530_v38 = vpop.f32.mrb[4].mxu1 }
 0x42a   :  { %534 = vst [vmem:[#allocation10] sm:$0xff] %v530_v38  ;;  %v891_v39 = vpop.f32.mrb[5].mxu1 }
 0x42d   :  { %v601_v40 = vpop.f32.mrb[6].mxu1 }
 0x42e   :  { %v605_v41 = vmul.f32 0.03125, %v601_v40  ;;  %v896_v42 = vpop.f32.mrb[7].mxu1 }
 0x430   :  { %v606_v43 = vsel %vm449_vm1, %v605_v41, -inf }
 0x431   :  { %607 = vmax.xlane.f32.xlu1 %v606_v43 }
 0x4be   :  { %v608_v44 = vpop.xlane.xlu1 %607 }
 0x4bf   :  { %v609_v45 = vsub.f32 %v605_v41, %v608_v44 }
 0x4c1   :  { %v610_v46 = vmul.f32 1.442695, %v609_v45 }
 0x4c3   :  { %1011 = vpow2.f32 %v610_v46 }
 0x4cd   :  { %v1012_v47 = vpop.eup %1011 }
 0x4ce   :  { %v612_v48 = vsel %vm449_vm1, %v1012_v47, 0.0 }
 0x4cf   :  { %613 = vadd.xlane.f32.xlu1 %v612_v48 }
 0x55c   :  { %v614_v49 = vpop.xlane.xlu1 %613 }
 0x55d   :  { %1013 = vrcp.f32 %v614_v49 }
 0x567   :  { %v1014_v50 = vpop.eup %1013 }
 0x568   :  { %v616_v51 = vmul.f32 %v1014_v50, %v1012_v47 }
 0x56a   :  { %900 = vmatmul.mubr.msk.f32.vlgmr.msra.gmra.mrb[8].mxu1 %vm449_vm1, %v616_v51 }
 0x63d   :  { %v686_v52 = vpop.f32.mrb[8].mxu1 }
 0x63e   :  { %690 = vst [vmem:[#allocation10 + $0x8] sm:$0xff] %v686_v52  ;;  %v901_v53 = vpop.f32.mrb[9].mxu1 }
 0x63f   :  { %1114 = shalt.err (!%p1111_p8)
}
 0x640   :  { %s1115_s11 = scalar_lea.hbm %s1311_s7, 256 }
 0x641   :  { %p1116_p9 = scmp.ne.s32.totalorder %s1311_s7, %s1115_s11  ;;  %p1119_p10 = scmp.lt.u32.totalorder %s1115_s11, %s1311_s7 }
 0x643   :  { %p1121_p11 = pnand %p1119_p10, %p1116_p9 }
 0x645   :  { %1124 = shalt.err (!%p1121_p11)
}
 0x646   :  { %702 = dma.vmem_to_hbm [thread:$0]  %s697_s30, 256, %s1311_s7, [#allocation4], %s1135_s13, %s1135_s13, %s1136_s14  }
 0x647   :  { %1131 = dma.done.wait [#allocation4], 256  }
 0x648   :  { %1132 = vsyncadd [#allocation4], 4294967040 }
 0x649   :  { %706 = vsyncpa [#allocation3], 1 }
 0x64a   :  { %707 = vsyncpa [#allocation6], 1 }
 0x64b   :  { %708 = vsyncpa [#allocation9], 1 }
 0x64c   :  { %709 = vsyncpa [#allocation4], 1 }

</bundles_post_ra>
